<compile_context>
chip_gen: v6e
topology: v6e:2x2x1
jax: 0.10.0
libtpu: 0.0.40
codegen_flags: <defaults>
</compile_context>

<pallas_src>
import functools
import math

import jax
import jax.numpy as jnp
from jax import lax
from jax.experimental import pallas as pl
from jax.experimental.pallas import tpu as pltpu

MASK_VALUE = -1000000.0  # matches the PyTorch reference's sequence_mask fill value


def _mha_kernel(q_ref, k_ref, v_ref, vl_ref,
                wq_ref, wk_ref, wv_ref, wo_ref,
                o_ref, concat_ref,
                *, num_heads, head_dim, scale, apply_mask):
    # q_ref: (1, tq, Dq)   k_ref: (1, Sk, Dk)   v_ref: (1, Sk, Dv)
    # vl_ref: (1, tq, 1) int32   w*_ref: (Din, H) / (H, H)   o_ref: (1, tq, H)
    # concat_ref: VMEM scratch (tq, H) f32 holding concat(heads).
    q = q_ref[0].astype(jnp.bfloat16)
    k = k_ref[0].astype(jnp.bfloat16)
    v = v_ref[0].astype(jnp.bfloat16)
    wq = wq_ref[...].astype(jnp.bfloat16)
    wk = wk_ref[...].astype(jnp.bfloat16)
    wv = wv_ref[...].astype(jnp.bfloat16)
    wo = wo_ref[...].astype(jnp.bfloat16)

    # Input projections: full-width (K = D, N = H) MXU matmuls, f32 accumulation.
    qp = jnp.dot(q, wq, preferred_element_type=jnp.float32)   # (tq, H)
    kp = jnp.dot(k, wk, preferred_element_type=jnp.float32)   # (Sk, H)
    vp = jnp.dot(v, wv, preferred_element_type=jnp.float32)   # (Sk, H)

    # Fold 1/sqrt(head_dim) into the queries once (not per-head, per-score).
    qp = (qp * scale).astype(jnp.bfloat16)
    kp = kp.astype(jnp.bfloat16)
    vp = vp.astype(jnp.bfloat16)

    tq = qp.shape[0]
    sk = kp.shape[0]

    if apply_mask:
        # Additive key-validity bias, computed once and shared across heads.
        vl = vl_ref[0]                                            # (tq, 1) int32
        key_ids = lax.broadcasted_iota(jnp.int32, (tq, sk), 1)    # (tq, sk)
        bias = jnp.where(key_ids < vl, 0.0, MASK_VALUE).astype(jnp.float32)
    else:
        bias = None

    for h in range(num_heads):            # static unroll; num_heads is small
        sl = slice(h * head_dim, (h + 1) * head_dim)
        qh = qp[:, sl]                    # (tq, dh) bf16
        kh = kp[:, sl]                    # (sk, dh) bf16
        vh = vp[:, sl]                    # (sk, dh) bf16

        # scores = qh @ kh^T  (contract on head dim, no transpose op).
        s = lax.dot_general(qh, kh, (((1,), (1,)), ((), ())),
                            preferred_element_type=jnp.float32)   # (tq, sk) f32
        if apply_mask:
            s = s + bias

        # Numerically-stable softmax over keys; divide -> EUP reciprocal.
        m = jnp.max(s, axis=-1, keepdims=True)
        e = jnp.exp(s - m)
        denom = jnp.sum(e, axis=-1, keepdims=True)
        p = (e * pl.reciprocal(denom, approx=True)).astype(jnp.bfloat16)
        # TODO(synk): training-mode dropout on `p` (identity in inference).

        ctx = jnp.dot(p, vh, preferred_element_type=jnp.float32)  # (tq, dh) f32
        concat_ref[:, sl] = ctx           # build concat(heads) in VMEM scratch

    # Single full-K output projection: (tq, H) @ (H, H) on the MXU.
    out = jnp.dot(concat_ref[...].astype(jnp.bfloat16), wo,
                  preferred_element_type=jnp.float32)
    o_ref[0] = out.astype(o_ref.dtype)


@functools.partial(jax.jit, static_argnames=("num_heads",))
def multi_head_attention(queries, keys, values, wq_t, wk_t, wv_t, wo_t,
                         valid_lens=None, *, num_heads):
    """MultiHeadAttention forward.

    queries: (B, Sq, Dq)   keys: (B, Sk, Dk)   values: (B, Sk, Dv)
    wq_t/wk_t/wv_t: (D*, H)  wo_t: (H, H)   (== torch Linear weight transposed)
    valid_lens: None, (B,), or (B, Sq)
    Returns: (B, Sq, H)

    Note: rows with valid_len == 0 yield uniform attention (exp(MASK)/Sk), which
    matches the -1e6 masked_softmax semantics of the reference module.
    """
    B, Sq, Dq = queries.shape
    _, Sk, Dk = keys.shape
    Dv = values.shape[-1]
    H = wq_t.shape[1]
    assert H % num_heads == 0
    head_dim = H // num_heads
    scale = 1.0 / math.sqrt(head_dim)

    apply_mask = valid_lens is not None
    if not apply_mask:
        vl = jnp.zeros((B, Sq, 1), dtype=jnp.int32)  # unused placeholder block
    elif valid_lens.ndim == 1:
        vl = jnp.broadcast_to(valid_lens.astype(jnp.int32)[:, None, None], (B, Sq, 1))
    else:
        vl = valid_lens.astype(jnp.int32)[:, :, None]

    # Query-tile grid axis; both axes "parallel" (megacore-friendly).
    tq = Sq if Sq <= 128 else 128
    n_q = pl.cdiv(Sq, tq)

    itemsize = queries.dtype.itemsize
    flops = 2 * B * (Sq * Dq * H + Sk * Dk * H + Sk * Dv * H
                     + 2 * num_heads * Sq * Sk * head_dim + Sq * H * H)
    transcendentals = B * num_heads * Sq * Sk
    bytes_accessed = itemsize * (queries.size + keys.size + values.size
                                 + wq_t.size + wk_t.size + wv_t.size + wo_t.size
                                 + B * Sq * H) + 4 * B * Sq

    kernel = functools.partial(_mha_kernel, num_heads=num_heads, head_dim=head_dim,
                               scale=scale, apply_mask=apply_mask)

    return pl.pallas_call(
        kernel,
        out_shape=jax.ShapeDtypeStruct((B, Sq, H), queries.dtype),
        grid_spec=pltpu.PrefetchScalarGridSpec(
            num_scalar_prefetch=0,
            grid=(B, n_q),
            in_specs=[
                pl.BlockSpec((1, tq, Dq), lambda b, qi: (b, qi, 0)),
                pl.BlockSpec((1, Sk, Dk), lambda b, qi: (b, 0, 0)),
                pl.BlockSpec((1, Sk, Dv), lambda b, qi: (b, 0, 0)),
                pl.BlockSpec((1, tq, 1), lambda b, qi: (b, qi, 0)),
                pl.BlockSpec((Dq, H), lambda b, qi: (0, 0)),   # weights resident
                pl.BlockSpec((Dk, H), lambda b, qi: (0, 0)),
                pl.BlockSpec((Dv, H), lambda b, qi: (0, 0)),
                pl.BlockSpec((H, H), lambda b, qi: (0, 0)),
            ],
            out_specs=pl.BlockSpec((1, tq, H), lambda b, qi: (b, qi, 0)),
            scratch_shapes=[pltpu.VMEM((tq, H), jnp.float32)],
        ),
        compiler_params=pltpu.CompilerParams(
            dimension_semantics=("parallel", "parallel"),
            # 48 MiB: above the scoped default on every chip, below v7x's 64 MiB
            # physical VMEM so the same config compiles on v5e/v6e/v7x.
            vmem_limit_bytes=48 * 1024 * 1024,
        ),
        cost_estimate=pl.CostEstimate(flops=flops,
                                      transcendentals=transcendentals,
                                      bytes_accessed=bytes_accessed),
    )(queries, keys, values, vl, wq_t, wk_t, wv_t, wo_t)


def _reference(queries, keys, values, wq_t, wk_t, wv_t, wo_t, valid_lens, num_heads):
    prec = lax.Precision.HIGHEST
    B, Sq, _ = queries.shape
    Sk = keys.shape[1]
    H = wq_t.shape[1]
    dh = H // num_heads
    qp = jnp.einsum("bsd,dh->bsh", queries, wq_t, precision=prec)
    kp = jnp.einsum("bsd,dh->bsh", keys, wk_t, precision=prec)
    vp = jnp.einsum("bsd,dh->bsh", values, wv_t, precision=prec)
    qh = qp.reshape(B, Sq, num_heads, dh).transpose(0, 2, 1, 3)
    kh = kp.reshape(B, Sk, num_heads, dh).transpose(0, 2, 1, 3)
    vh = vp.reshape(B, Sk, num_heads, dh).transpose(0, 2, 1, 3)
    scores = jnp.einsum("bhqd,bhkd->bhqk", qh, kh, precision=prec) / math.sqrt(dh)
    if valid_lens is not None:
        if valid_lens.ndim == 1:
            vlm = jnp.broadcast_to(valid_lens[:, None], (B, Sq))
        else:
            vlm = valid_lens
        mask = jnp.arange(Sk)[None, None, None, :] < vlm[:, None, :, None].astype(jnp.int32)
        scores = jnp.where(mask, scores, MASK_VALUE)
    p = jax.nn.softmax(scores, axis=-1)
    ctx = jnp.einsum("bhqk,bhkd->bhqd", p, vh, precision=prec)
    concat = ctx.transpose(0, 2, 1, 3).reshape(B, Sq, H)
    return jnp.einsum("bsh,ho->bso", concat, wo_t, precision=prec)


if __name__ == "__main__":
    B, Sq, Sk = 2, 8, 8
    query_size = key_size = value_size = 32
    num_hiddens, num_heads = 32, 4

    key = jax.random.PRNGKey(0)
    kq, kk, kv, k1, k2, k3, k4 = jax.random.split(key, 7)
    queries = jax.random.normal(kq, (B, Sq, query_size), dtype=jnp.float32)
    keys = jax.random.normal(kk, (B, Sk, key_size), dtype=jnp.float32)
    values = jax.random.normal(kv, (B, Sk, value_size), dtype=jnp.float32)

    w_scale = 0.1
    wq_t = jax.random.normal(k1, (query_size, num_hiddens), dtype=jnp.float32) * w_scale
    wk_t = jax.random.normal(k2, (key_size, num_hiddens), dtype=jnp.float32) * w_scale
    wv_t = jax.random.normal(k3, (value_size, num_hiddens), dtype=jnp.float32) * w_scale
    wo_t = jax.random.normal(k4, (num_hiddens, num_hiddens), dtype=jnp.float32) * w_scale

    valid_lens = jnp.array([3, 6], dtype=jnp.int32)

    out = multi_head_attention(queries, keys, values, wq_t, wk_t, wv_t, wo_t,
                               valid_lens, num_heads=num_heads)
    out = jax.block_until_ready(out)

    ref = _reference(queries, keys, values, wq_t, wk_t, wv_t, wo_t,
                     valid_lens, num_heads)
    assert out.shape == (B, Sq, num_hiddens)
    # bf16 MXU inputs -> loosened tolerance vs. the f32 HIGHEST reference.
    assert jnp.allclose(out, ref, atol=3e-2, rtol=3e-2), "mismatch vs reference"

    # Also exercise the valid_lens=None path once.
    out2 = jax.block_until_ready(
        multi_head_attention(queries, keys, values, wq_t, wk_t, wv_t, wo_t,
                             None, num_heads=num_heads))
    ref2 = _reference(queries, keys, values, wq_t, wk_t, wv_t, wo_t, None, num_heads)
    assert jnp.allclose(out2, ref2, atol=3e-2, rtol=3e-2), "mismatch vs reference (no mask)"

    print("KERNEL_OK")
</pallas_src>

<mosaic_0001>
module attributes {stable_mosaic.version = 11 : i64} {
  func.func @_mha_kernel(%arg0: i32, %arg1: i32, %arg2: memref<1x8x32xf32, #tpu.memory_space<vmem>>, %arg3: memref<1x8x32xf32, #tpu.memory_space<vmem>>, %arg4: memref<1x8x32xf32, #tpu.memory_space<vmem>>, %arg5: memref<1x8x1xi32, #tpu.memory_space<vmem>>, %arg6: memref<32x32xf32, #tpu.memory_space<vmem>>, %arg7: memref<32x32xf32, #tpu.memory_space<vmem>>, %arg8: memref<32x32xf32, #tpu.memory_space<vmem>>, %arg9: memref<32x32xf32, #tpu.memory_space<vmem>>, %arg10: memref<1x8x32xf32, #tpu.memory_space<vmem>>, %arg11: memref<8x32xf32, #tpu.memory_space<vmem>>) attributes {dimension_semantics = [#tpu.dimension_semantics<parallel>, #tpu.dimension_semantics<parallel>], iteration_bounds = array<i64: 2, 1>, scalar_prefetch = 0 : i64, scratch_operands = 1 : i64, tpu.core_type = #tpu.core_type<tc>, window_params = [{transform_indices = @transform_0, window_bounds = array<i64: 1, 8, 32>}, {transform_indices = @transform_1, window_bounds = array<i64: 1, 8, 32>}, {transform_indices = @transform_2, window_bounds = array<i64: 1, 8, 32>}, {transform_indices = @transform_3, window_bounds = array<i64: 1, 8, 1>}, {pipeline_mode = #tpu.pipeline_mode<synchronous>, transform_indices = @transform_4, window_bounds = array<i64: 32, 32>}, {pipeline_mode = #tpu.pipeline_mode<synchronous>, transform_indices = @transform_5, window_bounds = array<i64: 32, 32>}, {pipeline_mode = #tpu.pipeline_mode<synchronous>, transform_indices = @transform_6, window_bounds = array<i64: 32, 32>}, {pipeline_mode = #tpu.pipeline_mode<synchronous>, transform_indices = @transform_7, window_bounds = array<i64: 32, 32>}, {transform_indices = @transform_8, window_bounds = array<i64: 1, 8, 32>}]} {
    %c0 = arith.constant 0 : index
    %c0_0 = arith.constant 0 : index
    %c0_1 = arith.constant 0 : index
    %0 = vector.load %arg2[%c0, %c0_0, %c0_1] : memref<1x8x32xf32, #tpu.memory_space<vmem>>, vector<1x8x32xf32>
    %1 = vector.shape_cast %0 : vector<1x8x32xf32> to vector<8x32xf32>
    %2 = arith.truncf %1 : vector<8x32xf32> to vector<8x32xbf16>
    %c0_2 = arith.constant 0 : index
    %c0_3 = arith.constant 0 : index
    %c0_4 = arith.constant 0 : index
    %3 = vector.load %arg3[%c0_2, %c0_3, %c0_4] : memref<1x8x32xf32, #tpu.memory_space<vmem>>, vector<1x8x32xf32>
    %4 = vector.shape_cast %3 : vector<1x8x32xf32> to vector<8x32xf32>
    %5 = arith.truncf %4 : vector<8x32xf32> to vector<8x32xbf16>
    %c0_5 = arith.constant 0 : index
    %c0_6 = arith.constant 0 : index
    %c0_7 = arith.constant 0 : index
    %6 = vector.load %arg4[%c0_5, %c0_6, %c0_7] : memref<1x8x32xf32, #tpu.memory_space<vmem>>, vector<1x8x32xf32>
    %7 = vector.shape_cast %6 : vector<1x8x32xf32> to vector<8x32xf32>
    %8 = arith.truncf %7 : vector<8x32xf32> to vector<8x32xbf16>
    %c0_8 = arith.constant 0 : index
    %c0_9 = arith.constant 0 : index
    %9 = vector.load %arg6[%c0_8, %c0_9] : memref<32x32xf32, #tpu.memory_space<vmem>>, vector<32x32xf32>
    %10 = arith.truncf %9 : vector<32x32xf32> to vector<32x32xbf16>
    %c0_10 = arith.constant 0 : index
    %c0_11 = arith.constant 0 : index
    %11 = vector.load %arg7[%c0_10, %c0_11] : memref<32x32xf32, #tpu.memory_space<vmem>>, vector<32x32xf32>
    %12 = arith.truncf %11 : vector<32x32xf32> to vector<32x32xbf16>
    %c0_12 = arith.constant 0 : index
    %c0_13 = arith.constant 0 : index
    %13 = vector.load %arg8[%c0_12, %c0_13] : memref<32x32xf32, #tpu.memory_space<vmem>>, vector<32x32xf32>
    %14 = arith.truncf %13 : vector<32x32xf32> to vector<32x32xbf16>
    %c0_14 = arith.constant 0 : index
    %c0_15 = arith.constant 0 : index
    %15 = vector.load %arg9[%c0_14, %c0_15] : memref<32x32xf32, #tpu.memory_space<vmem>>, vector<32x32xf32>
    %16 = arith.truncf %15 : vector<32x32xf32> to vector<32x32xbf16>
    %cst = arith.constant dense<0.000000e+00> : vector<8x32xf32>
    %17 = tpu.matmul %2, %10, %cst {dimension_numbers = #tpu.dot_dimension_numbers<[1], [0], [0], [1], [0, 0, 1, 1], [], []>} : vector<8x32xbf16>, vector<32x32xbf16>, vector<8x32xf32> -> vector<8x32xf32>
    %cst_16 = arith.constant dense<0.000000e+00> : vector<8x32xf32>
    %18 = tpu.matmul %5, %12, %cst_16 {dimension_numbers = #tpu.dot_dimension_numbers<[1], [0], [0], [1], [0, 0, 1, 1], [], []>} : vector<8x32xbf16>, vector<32x32xbf16>, vector<8x32xf32> -> vector<8x32xf32>
    %cst_17 = arith.constant dense<0.000000e+00> : vector<8x32xf32>
    %19 = tpu.matmul %8, %14, %cst_17 {dimension_numbers = #tpu.dot_dimension_numbers<[1], [0], [0], [1], [0, 0, 1, 1], [], []>} : vector<8x32xbf16>, vector<32x32xbf16>, vector<8x32xf32> -> vector<8x32xf32>
    %cst_18 = arith.constant 0.353553385 : f32
    %20 = vector.broadcast %cst_18 : f32 to vector<8x32xf32>
    %21 = arith.mulf %17, %20 : vector<8x32xf32>
    %22 = arith.truncf %21 : vector<8x32xf32> to vector<8x32xbf16>
    %23 = arith.truncf %18 : vector<8x32xf32> to vector<8x32xbf16>
    %24 = arith.truncf %19 : vector<8x32xf32> to vector<8x32xbf16>
    %c0_19 = arith.constant 0 : index
    %c0_20 = arith.constant 0 : index
    %c0_21 = arith.constant 0 : index
    %25 = vector.load %arg5[%c0_19, %c0_20, %c0_21] : memref<1x8x1xi32, #tpu.memory_space<vmem>>, vector<1x8x1xi32>
    %26 = vector.shape_cast %25 : vector<1x8x1xi32> to vector<8x1xi32>
    %27 = tpu.iota {dimensions = array<i32: 1>} : vector<8x8xi32>
    %28 = vector.broadcast %26 : vector<8x1xi32> to vector<8x8xi32>
    %29 = arith.cmpi slt, %27, %28 : vector<8x8xi32>
    %cst_22 = arith.constant 0.000000e+00 : f32
    %cst_23 = arith.constant -1.000000e+06 : f32
    %30 = vector.broadcast %cst_22 : f32 to vector<8x8xf32>
    %31 = vector.broadcast %cst_23 : f32 to vector<8x8xf32>
    %32 = arith.select %29, %30, %31 : vector<8x8xi1>, vector<8x8xf32>
    %33 = vector.extract_strided_slice %22 {offsets = [0, 0], sizes = [8, 8], strides = [1, 1]} : vector<8x32xbf16> to vector<8x8xbf16>
    %34 = vector.extract_strided_slice %23 {offsets = [0, 0], sizes = [8, 8], strides = [1, 1]} : vector<8x32xbf16> to vector<8x8xbf16>
    %35 = vector.extract_strided_slice %24 {offsets = [0, 0], sizes = [8, 8], strides = [1, 1]} : vector<8x32xbf16> to vector<8x8xbf16>
    %cst_24 = arith.constant dense<0.000000e+00> : vector<8x8xf32>
    %36 = tpu.matmul %33, %34, %cst_24 {dimension_numbers = #tpu.dot_dimension_numbers<[1], [1], [0], [0], [0, 0, 1, 0], [], []>} : vector<8x8xbf16>, vector<8x8xbf16>, vector<8x8xf32> -> vector<8x8xf32>
    %37 = arith.addf %36, %32 : vector<8x8xf32>
    %cst_25 = arith.constant dense<0xFF800000> : vector<8xf32>
    %38 = vector.multi_reduction <maximumf>, %37, %cst_25 [1] : vector<8x8xf32> to vector<8xf32>
    %39 = vector.shape_cast %38 : vector<8xf32> to vector<8x1xf32>
    %40 = vector.broadcast %39 : vector<8x1xf32> to vector<8x8xf32>
    %41 = arith.subf %37, %40 : vector<8x8xf32>
    %42 = math.exp %41 : vector<8x8xf32>
    %cst_26 = arith.constant dense<0.000000e+00> : vector<8xf32>
    %43 = vector.multi_reduction <add>, %42, %cst_26 [1] : vector<8x8xf32> to vector<8xf32>
    %44 = vector.shape_cast %43 : vector<8xf32> to vector<8x1xf32>
    %45 = tpu.reciprocal %44 {approx = true} : vector<8x1xf32> -> vector<8x1xf32>
    %46 = vector.broadcast %45 : vector<8x1xf32> to vector<8x8xf32>
    %47 = arith.mulf %42, %46 : vector<8x8xf32>
    %48 = arith.truncf %47 : vector<8x8xf32> to vector<8x8xbf16>
    %cst_27 = arith.constant dense<0.000000e+00> : vector<8x8xf32>
    %49 = tpu.matmul %48, %35, %cst_27 {dimension_numbers = #tpu.dot_dimension_numbers<[1], [0], [0], [1], [0, 0, 1, 1], [], []>} : vector<8x8xbf16>, vector<8x8xbf16>, vector<8x8xf32> -> vector<8x8xf32>
    %c0_28 = arith.constant 0 : index
    %c0_29 = arith.constant 0 : index
    %50 = vector.load %arg11[%c0_28, %c0_29] : memref<8x32xf32, #tpu.memory_space<vmem>>, vector<8x8xf32>
    tpu.vector_store %arg11[%c0_28, %c0_29], %49 {strides = array<i32>} : memref<8x32xf32, #tpu.memory_space<vmem>>, vector<8x8xf32>,
    %51 = vector.extract_strided_slice %22 {offsets = [0, 8], sizes = [8, 8], strides = [1, 1]} : vector<8x32xbf16> to vector<8x8xbf16>
    %52 = vector.extract_strided_slice %23 {offsets = [0, 8], sizes = [8, 8], strides = [1, 1]} : vector<8x32xbf16> to vector<8x8xbf16>
    %53 = vector.extract_strided_slice %24 {offsets = [0, 8], sizes = [8, 8], strides = [1, 1]} : vector<8x32xbf16> to vector<8x8xbf16>
    %cst_30 = arith.constant dense<0.000000e+00> : vector<8x8xf32>
    %54 = tpu.matmul %51, %52, %cst_30 {dimension_numbers = #tpu.dot_dimension_numbers<[1], [1], [0], [0], [0, 0, 1, 0], [], []>} : vector<8x8xbf16>, vector<8x8xbf16>, vector<8x8xf32> -> vector<8x8xf32>
    %55 = arith.addf %54, %32 : vector<8x8xf32>
    %cst_31 = arith.constant dense<0xFF800000> : vector<8xf32>
    %56 = vector.multi_reduction <maximumf>, %55, %cst_31 [1] : vector<8x8xf32> to vector<8xf32>
    %57 = vector.shape_cast %56 : vector<8xf32> to vector<8x1xf32>
    %58 = vector.broadcast %57 : vector<8x1xf32> to vector<8x8xf32>
    %59 = arith.subf %55, %58 : vector<8x8xf32>
    %60 = math.exp %59 : vector<8x8xf32>
    %cst_32 = arith.constant dense<0.000000e+00> : vector<8xf32>
    %61 = vector.multi_reduction <add>, %60, %cst_32 [1] : vector<8x8xf32> to vector<8xf32>
    %62 = vector.shape_cast %61 : vector<8xf32> to vector<8x1xf32>
    %63 = tpu.reciprocal %62 {approx = true} : vector<8x1xf32> -> vector<8x1xf32>
    %64 = vector.broadcast %63 : vector<8x1xf32> to vector<8x8xf32>
    %65 = arith.mulf %60, %64 : vector<8x8xf32>
    %66 = arith.truncf %65 : vector<8x8xf32> to vector<8x8xbf16>
    %cst_33 = arith.constant dense<0.000000e+00> : vector<8x8xf32>
    %67 = tpu.matmul %66, %53, %cst_33 {dimension_numbers = #tpu.dot_dimension_numbers<[1], [0], [0], [1], [0, 0, 1, 1], [], []>} : vector<8x8xbf16>, vector<8x8xbf16>, vector<8x8xf32> -> vector<8x8xf32>
    %c0_34 = arith.constant 0 : index
    %c8 = arith.constant 8 : index
    %68 = vector.load %arg11[%c0_34, %c8] : memref<8x32xf32, #tpu.memory_space<vmem>>, vector<8x8xf32>
    tpu.vector_store %arg11[%c0_34, %c8], %67 {strides = array<i32>} : memref<8x32xf32, #tpu.memory_space<vmem>>, vector<8x8xf32>,
    %69 = vector.extract_strided_slice %22 {offsets = [0, 16], sizes = [8, 8], strides = [1, 1]} : vector<8x32xbf16> to vector<8x8xbf16>
    %70 = vector.extract_strided_slice %23 {offsets = [0, 16], sizes = [8, 8], strides = [1, 1]} : vector<8x32xbf16> to vector<8x8xbf16>
    %71 = vector.extract_strided_slice %24 {offsets = [0, 16], sizes = [8, 8], strides = [1, 1]} : vector<8x32xbf16> to vector<8x8xbf16>
    %cst_35 = arith.constant dense<0.000000e+00> : vector<8x8xf32>
    %72 = tpu.matmul %69, %70, %cst_35 {dimension_numbers = #tpu.dot_dimension_numbers<[1], [1], [0], [0], [0, 0, 1, 0], [], []>} : vector<8x8xbf16>, vector<8x8xbf16>, vector<8x8xf32> -> vector<8x8xf32>
    %73 = arith.addf %72, %32 : vector<8x8xf32>
    %cst_36 = arith.constant dense<0xFF800000> : vector<8xf32>
    %74 = vector.multi_reduction <maximumf>, %73, %cst_36 [1] : vector<8x8xf32> to vector<8xf32>
    %75 = vector.shape_cast %74 : vector<8xf32> to vector<8x1xf32>
    %76 = vector.broadcast %75 : vector<8x1xf32> to vector<8x8xf32>
    %77 = arith.subf %73, %76 : vector<8x8xf32>
    %78 = math.exp %77 : vector<8x8xf32>
    %cst_37 = arith.constant dense<0.000000e+00> : vector<8xf32>
    %79 = vector.multi_reduction <add>, %78, %cst_37 [1] : vector<8x8xf32> to vector<8xf32>
    %80 = vector.shape_cast %79 : vector<8xf32> to vector<8x1xf32>
    %81 = tpu.reciprocal %80 {approx = true} : vector<8x1xf32> -> vector<8x1xf32>
    %82 = vector.broadcast %81 : vector<8x1xf32> to vector<8x8xf32>
    %83 = arith.mulf %78, %82 : vector<8x8xf32>
    %84 = arith.truncf %83 : vector<8x8xf32> to vector<8x8xbf16>
    %cst_38 = arith.constant dense<0.000000e+00> : vector<8x8xf32>
    %85 = tpu.matmul %84, %71, %cst_38 {dimension_numbers = #tpu.dot_dimension_numbers<[1], [0], [0], [1], [0, 0, 1, 1], [], []>} : vector<8x8xbf16>, vector<8x8xbf16>, vector<8x8xf32> -> vector<8x8xf32>
    %c0_39 = arith.constant 0 : index
    %c16 = arith.constant 16 : index
    %86 = vector.load %arg11[%c0_39, %c16] : memref<8x32xf32, #tpu.memory_space<vmem>>, vector<8x8xf32>
    tpu.vector_store %arg11[%c0_39, %c16], %85 {strides = array<i32>} : memref<8x32xf32, #tpu.memory_space<vmem>>, vector<8x8xf32>,
    %87 = vector.extract_strided_slice %22 {offsets = [0, 24], sizes = [8, 8], strides = [1, 1]} : vector<8x32xbf16> to vector<8x8xbf16>
    %88 = vector.extract_strided_slice %23 {offsets = [0, 24], sizes = [8, 8], strides = [1, 1]} : vector<8x32xbf16> to vector<8x8xbf16>
    %89 = vector.extract_strided_slice %24 {offsets = [0, 24], sizes = [8, 8], strides = [1, 1]} : vector<8x32xbf16> to vector<8x8xbf16>
    %cst_40 = arith.constant dense<0.000000e+00> : vector<8x8xf32>
    %90 = tpu.matmul %87, %88, %cst_40 {dimension_numbers = #tpu.dot_dimension_numbers<[1], [1], [0], [0], [0, 0, 1, 0], [], []>} : vector<8x8xbf16>, vector<8x8xbf16>, vector<8x8xf32> -> vector<8x8xf32>
    %91 = arith.addf %90, %32 : vector<8x8xf32>
    %cst_41 = arith.constant dense<0xFF800000> : vector<8xf32>
    %92 = vector.multi_reduction <maximumf>, %91, %cst_41 [1] : vector<8x8xf32> to vector<8xf32>
    %93 = vector.shape_cast %92 : vector<8xf32> to vector<8x1xf32>
    %94 = vector.broadcast %93 : vector<8x1xf32> to vector<8x8xf32>
    %95 = arith.subf %91, %94 : vector<8x8xf32>
    %96 = math.exp %95 : vector<8x8xf32>
    %cst_42 = arith.constant dense<0.000000e+00> : vector<8xf32>
    %97 = vector.multi_reduction <add>, %96, %cst_42 [1] : vector<8x8xf32> to vector<8xf32>
    %98 = vector.shape_cast %97 : vector<8xf32> to vector<8x1xf32>
    %99 = tpu.reciprocal %98 {approx = true} : vector<8x1xf32> -> vector<8x1xf32>
    %100 = vector.broadcast %99 : vector<8x1xf32> to vector<8x8xf32>
    %101 = arith.mulf %96, %100 : vector<8x8xf32>
    %102 = arith.truncf %101 : vector<8x8xf32> to vector<8x8xbf16>
    %cst_43 = arith.constant dense<0.000000e+00> : vector<8x8xf32>
    %103 = tpu.matmul %102, %89, %cst_43 {dimension_numbers = #tpu.dot_dimension_numbers<[1], [0], [0], [1], [0, 0, 1, 1], [], []>} : vector<8x8xbf16>, vector<8x8xbf16>, vector<8x8xf32> -> vector<8x8xf32>
    %c0_44 = arith.constant 0 : index
    %c24 = arith.constant 24 : index
    %104 = vector.load %arg11[%c0_44, %c24] : memref<8x32xf32, #tpu.memory_space<vmem>>, vector<8x8xf32>
    tpu.vector_store %arg11[%c0_44, %c24], %103 {strides = array<i32>} : memref<8x32xf32, #tpu.memory_space<vmem>>, vector<8x8xf32>,
    %c0_45 = arith.constant 0 : index
    %c0_46 = arith.constant 0 : index
    %105 = vector.load %arg11[%c0_45, %c0_46] : memref<8x32xf32, #tpu.memory_space<vmem>>, vector<8x32xf32>
    %106 = arith.truncf %105 : vector<8x32xf32> to vector<8x32xbf16>
    %cst_47 = arith.constant dense<0.000000e+00> : vector<8x32xf32>
    %107 = tpu.matmul %106, %16, %cst_47 {dimension_numbers = #tpu.dot_dimension_numbers<[1], [0], [0], [1], [0, 0, 1, 1], [], []>} : vector<8x32xbf16>, vector<32x32xbf16>, vector<8x32xf32> -> vector<8x32xf32>
    %c0_48 = arith.constant 0 : index
    %c0_49 = arith.constant 0 : index
    %c0_50 = arith.constant 0 : index
    %108 = vector.load %arg10[%c0_48, %c0_49, %c0_50] : memref<1x8x32xf32, #tpu.memory_space<vmem>>, vector<1x8x32xf32>
    %109 = vector.shape_cast %108 : vector<1x8x32xf32> to vector<8x32xf32>
    %110 = vector.shape_cast %107 : vector<8x32xf32> to vector<1x8x32xf32>
    tpu.vector_store %arg10[%c0_48, %c0_49, %c0_50], %110 {strides = array<i32>} : memref<1x8x32xf32, #tpu.memory_space<vmem>>, vector<1x8x32xf32>,
    return
  }
  func.func @transform_0(%arg0: i32, %arg1: i32) -> (i32, i32, i32) {
    %c0_i32 = arith.constant 0 : i32
    %c0_i32_0 = arith.constant 0 : i32
    return %arg0, %arg1, %c0_i32 : i32, i32, i32
  }
  func.func @transform_1(%arg0: i32, %arg1: i32) -> (i32, i32, i32) {
    %c0_i32 = arith.constant 0 : i32
    %c0_i32_0 = arith.constant 0 : i32
    %c0_i32_1 = arith.constant 0 : i32
    return %arg0, %c0_i32, %c0_i32_0 : i32, i32, i32
  }
  func.func @transform_2(%arg0: i32, %arg1: i32) -> (i32, i32, i32) {
    %c0_i32 = arith.constant 0 : i32
    %c0_i32_0 = arith.constant 0 : i32
    %c0_i32_1 = arith.constant 0 : i32
    return %arg0, %c0_i32, %c0_i32_0 : i32, i32, i32
  }
  func.func @transform_3(%arg0: i32, %arg1: i32) -> (i32, i32, i32) {
    %c0_i32 = arith.constant 0 : i32
    %c0_i32_0 = arith.constant 0 : i32
    return %arg0, %arg1, %c0_i32 : i32, i32, i32
  }
  func.func @transform_4(%arg0: i32, %arg1: i32) -> (i32, i32) {
    %c0_i32 = arith.constant 0 : i32
    %c0_i32_0 = arith.constant 0 : i32
    %c0_i32_1 = arith.constant 0 : i32
    return %c0_i32, %c0_i32_0 : i32, i32
  }
  func.func @transform_5(%arg0: i32, %arg1: i32) -> (i32, i32) {
    %c0_i32 = arith.constant 0 : i32
    %c0_i32_0 = arith.constant 0 : i32
    %c0_i32_1 = arith.constant 0 : i32
    return %c0_i32, %c0_i32_0 : i32, i32
  }
  func.func @transform_6(%arg0: i32, %arg1: i32) -> (i32, i32) {
    %c0_i32 = arith.constant 0 : i32
    %c0_i32_0 = arith.constant 0 : i32
    %c0_i32_1 = arith.constant 0 : i32
    return %c0_i32, %c0_i32_0 : i32, i32
  }
  func.func @transform_7(%arg0: i32, %arg1: i32) -> (i32, i32) {
    %c0_i32 = arith.constant 0 : i32
    %c0_i32_0 = arith.constant 0 : i32
    %c0_i32_1 = arith.constant 0 : i32
    return %c0_i32, %c0_i32_0 : i32, i32
  }
  func.func @transform_8(%arg0: i32, %arg1: i32) -> (i32, i32, i32) {
    %c0_i32 = arith.constant 0 : i32
    %c0_i32_0 = arith.constant 0 : i32
    return %arg0, %arg1, %c0_i32 : i32, i32, i32
  }
}

</mosaic_0001>

<bundles_post_ra>
// kernel: multi_head_attention.1
= control target key start
LH: loop header
LB: loop body
LE: loop exit
PB: predicated region body
PF: predicated region fallthrough
CT: control target
= control target key end

     0   :  { %s2296_s0 = inlined_call_operand.vmem [shape: f32[2,8,32], index: 0, kind: input, shape index: {}]   ;;  %s2297_s1 = inlined_call_operand.hbm [shape: f32[2,8,32], index: 1, kind: input, shape index: {}]   ;;  %s2298_s2 = inlined_call_operand.hbm [shape: f32[2,8,32], index: 2, kind: input, shape index: {}]   ;;  %s2299_s3 = inlined_call_operand.vmem [shape: s32[2,8,1], index: 3, kind: input, shape index: {}]   ;;  %s2300_s4 = inlined_call_operand.hbm [shape: f32[32,32], index: 4, kind: input, shape index: {}]   ;;  %s2301_s5 = inlined_call_operand.hbm [shape: f32[32,32], index: 5, kind: input, shape index: {}]   ;;  %s2302_s6 = inlined_call_operand.hbm [shape: f32[32,32], index: 6, kind: input, shape index: {}]   ;;  %s2303_s7 = inlined_call_operand.hbm [shape: f32[32,32], index: 7, kind: input, shape index: {}]   ;;  %s2304_s8 = inlined_call_operand.hbm [shape: f32[2,8,32], index: 8, kind: output, shape index: {}]  }
   0x1   :  { %2307 = sst [smem:[#allocation22_spill]] %s2297_s1 }
   0x2   :  { %2308 = sst [smem:[#allocation23_spill]] %s2300_s4 }
   0x3   :  { %2309 = sst [smem:[#allocation24_spill]] %s2301_s5 }
   0x4   :  { %2310 = sst [smem:[#allocation25_spill]] %s2302_s6 }
   0x5   :  { %2311 = sst [smem:[#allocation26_spill]] %s2303_s7 }
   0x6   :  { %13 = vsyncpa [#allocation4], 0 }
   0x7   :  { %15 = vsyncpa [#allocation4 + $0x1], 0 }
   0x8   :  { %16 = vsyncpa [#allocation7], 0 }
   0x9   :  { %18 = vsyncpa [#allocation7 + $0x1], 0 }
   0xa   :  { %19 = vsyncpa [#allocation10], 0 }
   0xb   :  { %20 = vsyncpa [#allocation13], 0 }
   0xc   :  { %21 = vsyncpa [#allocation5], 0 }
   0xd   :  { %23 = vsyncpa [#allocation5 + $0x1], 0  ;;  %s1953_s27 = smov 0   ;;  %s1955_s28 = smov 0  }
   0xe   :  { %s1957_s29 = smov 0   ;;  %s1959_s30 = smov 0  }
   0xf   :  { %s1961_s9 = smov 0   ;;  %s1963_s10 = smov 0  }
  0x10 LB: > { %s1984_s11 = sadd.s32 4294967295, %s1887_s10   ;;  %p1350_p0 = scmp.ge.s32.totalorder %s1887_s10, 1  ;;  %s1887_s10 = sphi %s1963_s10, %s29_s10   ;;  %s1883_s9 = sphi %s1961_s9, %s2337_s9   ;;  %s1879_s30 = sphi %s1959_s30, %s2336_s30   ;;  %s1875_s29 = sphi %s1957_s29, %s2335_s29   ;;  %s1871_s28 = sphi %s1955_s28, %s2334_s28   ;;  %s1867_s27 = sphi %s1953_s27, %s2333_s27  }
  0x11   : > { %p2306_p1 = scmp.eq.s32.totalorder %s1984_s11, 0  ;;  %p266_p2 = scmp.lt.s32.totalorder %s1887_s10, 3 }
  0x12   : > { %s1889_s13 = smov [#allocation8]   ;;  %s1890_s16 = smov [#allocation9]  }
  0x13   : > { %p1989_p3 = pnand %p1350_p0, %p266_p2  ;;  %s278_s14 = sshll.u32 %s1889_s13, 4  ;;  %s279_s14 = int_to_ptr.vmem [resolvable:$true] %s278_s14 }
  0x14   : > { %s291_s17 = sshll.u32 %s1890_s16, 4  ;;  %s1891_s18 = smov [#allocation11]   ;;  %s292_s17 = int_to_ptr.vmem [resolvable:$true] %s291_s17 }
  0x15   : > { %p1516_p4 = pneg %p1989_p3  ;;  %s304_s19 = sshll.u32 %s1891_s18, 4  ;;  %s305_s19 = int_to_ptr.vmem [resolvable:$true] %s304_s19 }
  0x16   : > { %s1642_s20 = scalar_lea.vmem %s279_s14, 512  ;;  %p1650_p11 = scmp.lt.s32.totalorder %s279_s14, %s279_s14 }
  0x17   : > { %p1998_p6 = pnand %p1516_p4, %p2306_p1  ;;  %p1643_p8 = scmp.ne.s32.totalorder %s279_s14, %s1642_s20 }
  0x18   : > { %p1651_p12 = scmp.lt.s32.totalorder %s1642_s20, %s1642_s20 }
  0x19   : > { %p1633_p7 = pneg %p1998_p6 }
  0x1a   : > { %p1652_p13 = por %p1651_p12, %p1650_p11 }
  0x1b   : > { %p1645_p9 = pnand %p1643_p8, %p1633_p7 }
  0x1d   : > { %p1646_p10 = pneg %p1645_p9 }
  0x1f   : > { %p1653_p0 = pnand %p1652_p13, %p1646_p10 }
  0x21   : > { %1656 = shalt.err (!%p1653_p0)
}
  0x22   : > { %s1892_s21 = smov 128   ;;  %s1893_s22 = smov 8  }
  0x23   : > { %s2314_s4 = sld [smem:[#allocation23_spill]]  ;;  %s1668_s25 = scalar_lea.vmem %s292_s17, 512 }
  0x24   : > { %p1669_p2 = scmp.ne.s32.totalorder %s292_s17, %s1668_s25  ;;  %p1676_p9 = scmp.lt.s32.totalorder %s292_s17, %s292_s17 }
  0x25   : > { %p1677_p10 = scmp.lt.s32.totalorder %s1668_s25, %s1668_s25 }
  0x26   : > { %p1671_p4 = pnand %p1669_p2, %p1633_p7 }
  0x27   : > { %p1678_p11 = por %p1677_p10, %p1676_p9 }
  0x28   : > { %p1672_p8 = pneg %p1671_p4 }
  0x29   : > { %1519 = dma.hbm_to_vmem [thread:$0]  (!%p1998_p6), %s2314_s4, 512, %s279_s14, [#allocation7], %s1892_s21, %s1892_s21, %s1893_s22  }
  0x2a   : > { %p1679_p12 = pnand %p1678_p11, %p1672_p8 }
  0x2c   : > { %1682 = shalt.err (!%p1679_p12)
}
  0x2d   : > { %s2315_s5 = sld [smem:[#allocation24_spill]]  ;;  %s1694_s14 = scalar_lea.vmem %s305_s19, 512 }
  0x2e   : > { %p1695_p13 = scmp.ne.s32.totalorder %s305_s19, %s1694_s14  ;;  %p1702_p4 = scmp.lt.s32.totalorder %s305_s19, %s305_s19 }
  0x2f   : > { %p1703_p8 = scmp.lt.s32.totalorder %s1694_s14, %s1694_s14 }
  0x30   : > { %p1697_p0 = pnand %p1695_p13, %p1633_p7 }
  0x31   : > { %p1704_p9 = por %p1703_p8, %p1702_p4 }
  0x32   : > { %p1698_p2 = pneg %p1697_p0 }
  0x33   : > { %1522 = dma.hbm_to_vmem [thread:$0]  (!%p1998_p6), %s2315_s5, 512, %s292_s17, [#allocation10], %s1892_s21, %s1892_s21, %s1893_s22  }
  0x34   : > { %p1705_p10 = pnand %p1704_p9, %p1698_p2 }
  0x36   : > { %1708 = shalt.err (!%p1705_p10)
}
  0x37   : > { %s2316_s6 = sld [smem:[#allocation25_spill]]  ;;  %s1894_s17 = smov [#allocation12]  }
  0x38   : > { %s317_s20 = sshll.u32 %s1894_s17, 4  ;;  %s318_s20 = int_to_ptr.vmem [resolvable:$true] %s317_s20 }
  0x39   : > { %s1720_s23 = scalar_lea.vmem %s318_s20, 512  ;;  %p1728_p0 = scmp.lt.s32.totalorder %s318_s20, %s318_s20 }
  0x3a   : > { %p1721_p11 = scmp.ne.s32.totalorder %s318_s20, %s1720_s23  ;;  %p1729_p2 = scmp.lt.s32.totalorder %s1720_s23, %s1720_s23 }
  0x3c   : > { %p1723_p12 = pnand %p1721_p11, %p1633_p7  ;;  %p1730_p4 = por %p1729_p2, %p1728_p0 }
  0x3d   : > { %1525 = dma.hbm_to_vmem [thread:$0]  (!%p1998_p6), %s2316_s6, 512, %s305_s19, [#allocation10], %s1892_s21, %s1892_s21, %s1893_s22  }
  0x3e   : > { %p1724_p13 = pneg %p1723_p12 }
  0x40   : > { %p1731_p8 = pnand %p1730_p4, %p1724_p13 }
  0x42   : > { %1734 = shalt.err (!%p1731_p8)
}
  0x43   : > { %s2317_s7 = sld [smem:[#allocation26_spill]]  ;;  %s1349_s15 = sadd.s32 4294967294, %s1887_s10  }
  0x44   : > { %s41_s25 = sadd.s32 1, %s1883_s9  ;;  %s76_s26 = sadd.s32 1, %s1875_s29 }
  0x45   : > { %p43_p7 = scmp.ge.s32.totalorder %s41_s25, 2  ;;  %p83_p9 = scmp.ne.s32.totalorder %s1875_s29, %s1871_s28 }
  0x46   : > { %p84_p10 = scmp.eq.s32.totalorder %s1887_s10, 0  ;;  %p89_p12 = scmp.ne.s32.totalorder %s1871_s28, %s1867_s27 }
  0x47   : > { %s2339_s25 = smov (%p43_p7, %s41_s25), 0  ;;  %p259_p4 = scmp.eq.s32.totalorder %s1349_s15, 1 }
  0x48   : > { %2318 = sst [smem:[#allocation21_spill]] %s2339_s25  ;;  %p2056_p11 = por %p84_p10, %p83_p9 }
  0x49   : > { %1528 = dma.hbm_to_vmem [thread:$0]  (!%p1998_p6), %s2317_s7, 512, %s318_s20, [#allocation13], %s1892_s21, %s1892_s21, %s1893_s22  }
  0x4a   : > { %s73_s21 = ssub.s32 %s1883_s9, %s2339_s25  ;;  %p253_p6 = scmp.eq.s32.totalorder %s1984_s11, 1 }
  0x4b   : > { %p74_p13 = scmp.eq.s32.totalorder %s73_s21, 0  ;;  %p2067_p0 = por %p2306_p1, %p89_p12 }
  0x4c   : > { %p2071_p2 = por %p253_p6, %p83_p9  ;;  %p2078_p8 = por %p259_p4, %p89_p12 }
  0x4d   : > { %s2076_s16 = scalar_select %p74_p13, %s1875_s29, %s76_s26  }
  0x4e   : > { %p1544_p7 = scmp.lt.s32.totalorder %s1887_s10, 2  ;;  %s341_s17 = sand.u32 1, %s1875_s29  }
  0x4f   : > { %s1357_s20 = sshll.u32 %s1883_s9, 7  ;;  %s1356_s23 = sshll.u32 %s341_s17, 3 }
  0x50   : > { %s2323_s1 = sld [smem:[#allocation22_spill]]  ;;  %s345_s4 = scalar_lea.vmem [#allocation3], %s1356_s23 }
  0x51   : > { %s352_s5 = sshll.u32 %s345_s4, 4  ;;  %p2090_p9 = pnand %p1544_p7, %p2056_p11  ;;  %s353_s5 = int_to_ptr.vmem [resolvable:$true] %s352_s5 }
  0x52   : > { %s2097_s7 = scalar_lea.hbm %s2298_s2, %s1357_s20  ;;  %s342_s25 = scalar_lea.sflag [#allocation4], %s341_s17 }
  0x53   : > { %p1737_p10 = pneg %p2090_p9  ;;  %s1748_s19 = scalar_lea.vmem %s353_s5, 128 }
  0x54   : > { %p1749_p12 = scmp.ne.s32.totalorder %s353_s5, %s1748_s19  ;;  %s1895_s4 = smov [#allocation3]  }
  0x55   : > { %s1753_s13 = sshll.u32 %s1895_s4, 4  ;;  %s1754_s13 = int_to_ptr.vmem [resolvable:$false] %s1753_s13 }
  0x56   : > { %s350_s21 = scalar_lea.hbm %s2323_s1, %s1357_s20  ;;  %p1751_p6 = pnand %p1749_p12, %p1737_p10 }
  0x57   : > { %s1755_s24 = scalar_lea.vmem %s1754_s13, 256  ;;  %p1756_p13 = scmp.lt.s32.totalorder %s353_s5, %s1754_s13 }
  0x58   : > { %p1752_p11 = pneg %p1751_p6  ;;  %p1757_p4 = scmp.lt.s32.totalorder %s1755_s24, %s1748_s19 }
  0x5a   : > { %p1758_p7 = por %p1757_p4, %p1756_p13 }
  0x5c   : > { %p1759_p5 = pnand %p1758_p7, %p1752_p11 }
  0x5e   : > { %1762 = shalt.err (!%p1759_p5)
}
  0x5f   : > { %1532 = dma.hbm_to_vmem [thread:$0]  (!%p2090_p9), %s350_s21, 128, %s353_s5, %s342_s25  }
  0x60   : > { %s359_s17 = sand.u32 1, %s1887_s10   ;;  %s363_s20 = scalar_lea.vmem [#allocation6], %s1356_s23 }
  0x61   : > { %s370_s15 = sshll.u32 %s363_s20, 4  ;;  %s360_s26 = scalar_lea.sflag [#allocation7], %s359_s17  ;;  %s371_s15 = int_to_ptr.vmem [resolvable:$true] %s370_s15 }
  0x62   : > { %s1776_s1 = scalar_lea.vmem %s371_s15, 128  ;;  %s1896_s19 = smov [#allocation6]  }
  0x63   : > { %p1777_p12 = scmp.ne.s32.totalorder %s371_s15, %s1776_s1  ;;  %s1781_s4 = sshll.u32 %s1896_s19, 4  ;;  %s1782_s4 = int_to_ptr.vmem [resolvable:$false] %s1781_s4 }
  0x64   : > { %s1783_s13 = scalar_lea.vmem %s1782_s4, 256  ;;  %p1784_p5 = scmp.lt.s32.totalorder %s371_s15, %s1782_s4 }
  0x65   : > { %p1779_p6 = pnand %p1777_p12, %p1737_p10  ;;  %p1785_p11 = scmp.lt.s32.totalorder %s1783_s13, %s1776_s1 }
  0x67   : > { %p1780_p1 = pneg %p1779_p6  ;;  %p1786_p13 = por %p1785_p11, %p1784_p5 }
  0x69   : > { %p1787_p4 = pnand %p1786_p13, %p1780_p1 }
  0x6b   : > { %1790 = shalt.err (!%p1787_p4)
}
  0x6c   : > { %1535 = dma.hbm_to_vmem [thread:$0]  (!%p2090_p9), %s2097_s7, 128, %s371_s15, %s360_s26  }
  0x6d   : > { %389 = sbr.rel (%p1989_p3) target bundleno = 1508 (0x5e4), region = 52  ;;  %s2116_s5 = sand.u32 (!%p1989_p3), 1, %s1871_s28  }
  0x6e   : > { %s2119_s25 = sshll.u32 (!%p1989_p3), %s2116_s5, 3  ;;  %s392_s1 = scalar_lea.sflag (!%p1989_p3), [#allocation4], %s2116_s5 }
  0x6f   : > { %s395_s23 = scalar_lea.vmem (!%p1989_p3), [#allocation3], %s2119_s25 }
  0x72   : > { %1842 = dma.done.wait (%p2067_p0), %s392_s1, 128  }
  0x73   : > { %1844 = vsyncadd (%p2067_p0), %s392_s1, 4294967168  ;;  %s400_s6 = sand.u32 1, %s1984_s11   ;;  %s404_s12 = scalar_lea.vmem [#allocation6], %s2119_s25 }
  0x74   : > { %s401_s7 = scalar_lea.sflag [#allocation7], %s400_s6 }
  0x75   : > { %1846 = dma.done.wait (%p2067_p0), %s401_s7, 128  }
  0x76   : > { %1848 = vsyncadd (%p2067_p0), %s401_s7, 4294967168  ;;  %p2325_p1 = scmp.eq.s32.totalorder %s1984_s11, 0 }
  0x78   : > { %1850 = dma.done.wait (%p2325_p1), [#allocation7], 512   ;;  %p2326_p3 = pmov %p2325_p1 }
  0x79   : > { %p2327_p9 = pmov %p2325_p1 }
  0x7a   : > { %1852 = vsyncadd (%p2326_p3), [#allocation7], 4294966784 }
  0x7b   : > { %1854 = dma.done.wait (%p2327_p9), [#allocation10], 1024   ;;  %p2328_p10 = pmov %p2325_p1 }
  0x7c   : > { %p2329_p7 = pmov %p2325_p1 }
  0x7d   : > { %1856 = vsyncadd (%p2328_p10), [#allocation10], 4294966272 }
  0x7e   : > { %1858 = dma.done.wait (%p2329_p7), [#allocation13], 512   ;;  %p2330_p12 = pmov %p2325_p1 }
  0x7f   : > { %p472_p0 = scmp.lt.s32.totalorder %s1879_s30, 1  ;;  %v1897_v0 = vmov 0.0   ;;  %vm1898_vm0 = vmmov 0   ;;  %v495_v1 = vld [vmem:[#allocation8 + $0x10] sm:$0xff]  ;;  %v496_v2 = vld [vmem:[#allocation8 + $0x18] sm:$0xff]  ;;  %v493_v6 = vld [vmem:[#allocation8] sm:$0xff]  ;;  %v652_v48 = vlaneseq }
  0x80   : > { %1860 = vsyncadd (%p2330_p12), [#allocation13], 4294966784  ;;  %1414 = vmatprep.subr.bf16.mxu0 %v1897_v0  ;;  %1422 = vmatprep.subr.bf16.mxu1 %v1897_v0  ;;  %v501_v3 = vld [vmem:[#allocation9 + $0x10] sm:$0xff]  ;;  %v498_v4 = vpack.c.bf16 %v496_v2, %v495_v1  ;;  %v502_v5 = vld [vmem:[#allocation9 + $0x18] sm:$0xff]  ;;  %vm517_vm1 = vcmask 261120   ;;  %v1899_v17 = vmov 0  }
  0x81   : > { %1418 = vmatprep.mubr.msk.bf16.mxu0 %vm1898_vm0, %v1897_v0  ;;  %1426 = vmatprep.mubr.msk.bf16.mxu1 %vm1898_vm0, %v1897_v0  ;;  %s2153_s22 = scalar_select %p472_p0, %s1879_s30, 1  ;;  %v494_v7 = vld [vmem:[#allocation8 + $0x8] sm:$0xff]  ;;  %v504_v8 = vpack.c.bf16 %v502_v5, %v501_v3  ;;  %v499_v9 = vld [vmem:[#allocation9] sm:$0xff]  ;;  %vm659_vm2 = vcmask 64512   ;;  %v507_v31 = vld [vmem:[#allocation11 + $0x10] sm:$0xff]  ;;  %v653_v49 = vand.u32 127, %v652_v48 }
  0x82   : > { %v500_v10 = vld [vmem:[#allocation9 + $0x8] sm:$0xff]  ;;  %1415 = vmatpush3.bf16.msra.mxu0 %v498_v4  ;;  %v497_v11 = vpack.c.bf16 %v494_v7, %v493_v6  ;;  %1614 = vset.pattern.permute.xlu0 %v1899_v17  ;;  %s1900_s20 = smov 112   ;;  %s1901_s15 = smov 120   ;;  %v508_v32 = vld [vmem:[#allocation11 + $0x18] sm:$0xff]  ;;  %v505_v33 = vld [vmem:[#allocation11] sm:$0xff]  ;;  %vm721_vm4 = vcmask 1043456  }
  0x83   : > { %s1368_s11 = sshll.u32 %s2153_s22, 3  ;;  %1423 = vmatpush3.bf16.msra.mxu1 %v504_v8  ;;  %1416 = vmatprep.subr.bf16.mxu0 %v1897_v0  ;;  %v503_v13 = vpack.c.bf16 %v500_v10, %v499_v9  ;;  %v489_v14 = vld [vmem:[%s395_s23] sm:$0xff]  ;;  %s1902_s13 = smov 104   ;;  %v510_v34 = vpack.c.bf16 %v508_v32, %v507_v31  ;;  %v491_v37 = vld [vmem:[%s404_s12] sm:$0xff]  ;;  %v1903_v51 = vmov -1000000.0  }
  0x84   : > { %s478_s17 = scalar_lea.vmem %s2296_s0, %s1368_s11  ;;  %1424 = vmatprep.subr.bf16.mxu1 %v1897_v0  ;;  %v490_v16 = vpack.c.bf16 %v489_v14, %v489_v14  ;;  %s485_s4 = scalar_lea.vmem %s2299_s3, %s1368_s11  ;;  %v506_v35 = vld [vmem:[#allocation11 + $0x8] sm:$0xff]  ;;  %v492_v38 = vpack.c.bf16 %v491_v37, %v491_v37  ;;  %vm883_vm5 = vcmask 130112   ;;  %vm999_vm6 = vcmask 195712  }
  0x85   : > { %v487_v12 = vld [vmem:[%s478_s17] sm:$0xff]  ;;  %v509_v36 = vpack.c.bf16 %v506_v35, %v505_v33  ;;  %s1904_s1 = smov 8   ;;  %s1905_s23 = smov 16   ;;  %vm1115_vm7 = vcmask 261312  }
  0x86   : > { %v488_v15 = vpack.c.bf16 %v487_v12, %v487_v12  ;;  %1417 = vmatpush3.bf16.msra.mxu0 %v497_v11  ;;  %v651_v30 = vld [vmem:[%s485_s4] sm:$0xff]  ;;  %s1906_s6 = smov 24   ;;  %s1383_s7 = sshll.u32 %s1879_s30, 7 }
  0x87   : > { %1425 = vmatpush3.bf16.msra.mxu1 %v503_v13  ;;  %1430 = vmatprep.subr.bf16.mxu0 %v1897_v0  ;;  %s471_s12 = scalar_lea.vmem [#allocation14], %s2119_s25  ;;  %s2247_s24 = scalar_lea.hbm %s2304_s8, %s1383_s7 }
  0x88   : > { %1438 = vmatprep.subr.bf16.mxu1 %v1897_v0  ;;  %s1178_s22 = sshll.u32 %s471_s12, 4  ;;  %s1164_s17 = scalar_lea.sflag [#allocation5], %s2116_s5  ;;  %s2249_s22 = int_to_ptr.vmem [resolvable:$true] %s1178_s22 }
  0x89   : > { %1419 = vmatmul.mubr.msk.bf16.vlgmr.msra.gmra.mxu0 %vm517_vm1, %v488_v15  ;;  %s1907_s30 = smov [#allocation14]  }
  0x8a   : > { %1427 = vmatmul.mubr.msk.bf16.vlgmr.msra.gmra.mxu1 %vm517_vm1, %v490_v16  ;;  %1434 = vmatprep.mubr.msk.bf16.mxu0 %vm1898_vm0, %v1897_v0  ;;  %s1795_s25 = sshll.u32 %s1907_s30, 4  ;;  %s1796_s25 = int_to_ptr.vmem [resolvable:$false] %s1795_s25 }
  0x8b   : > { %1440 = vmatprep.mubr.msk.bf16.mxu1 %vm1898_vm0, %v1897_v0  ;;  %1431 = vmatpush3.bf16.msra.mxu0 %v510_v34  ;;  %p1798_p13 = scmp.lt.s32.totalorder %s2249_s22, %s1796_s25 }
  0x8c   : > { %1432 = vmatprep.subr.bf16.mxu0 %v1897_v0 }
  0x8f   : > { %1433 = vmatpush3.bf16.msra.mxu0 %v509_v36 }
  0x90   : > { %1444 = vmatprep.subr.bf16.mxu0 %v1897_v0 }
  0x92   : > { %1435 = vmatmul.mubr.msk.bf16.vlgmr.msra.gmra.mxu0 %vm517_vm1, %v492_v38 }
  0x93   : > { %1446 = vmatprep.mubr.msk.bf16.mxu0 %vm1898_vm0, %v1897_v0 }
 0x149   : > { %v555_v18 = vpop.f32.mrf.mxu0 }
 0x14a   : > { %v647_v19 = vmul.f32 0.35355338, %v555_v18  ;;  %v598_v20 = vpop.f32.mrf.mxu1 }
 0x14b   : > { %v649_v21 = vpack.c.bf16 %v598_v20, %v598_v20  ;;  %v1420_v22 = vpop.f32.mrf.mxu0 }
 0x14c   : > { %v1428_v23 = vpop.f32.mrf.mxu1  ;;  %v648_v24 = vpack.c.bf16 %v647_v19, %v647_v19 }
 0x14d   : > { %887 = vrot.lane.b32.xlu1 %v649_v21, %s1900_s20  ;;  %770 = vrot.lane.b32.xlu0 %v649_v21, %s1901_s15  ;;  %v558_v25 = vpop.f32.mrf.mxu0  ;;  %v664_v26 = vsel %vm659_vm2, %v649_v21, 0 }
 0x14e   : > { %v601_v27 = vpop.f32.mrf.mxu1  ;;  %1439 = vmatpush3.bf16.xpose.msra.mxu1 %v664_v26 }
 0x14f   : > { %v1421_v28 = vpop.f32.mrf.mxu0  ;;  %1450 = vmatprep.subr.bf16.mxu1 %v1897_v0 }
 0x150   : > { %v1429_v29 = vpop.f32.mrf.mxu1 }
 0x151   : > { %885 = vrot.lane.b32.xlu1 %v648_v24, %s1900_s20  ;;  %767 = vrot.lane.b32.xlu0 %v648_v24, %s1901_s15 }
 0x152   : > { %v641_v59 = vpop.f32.mrf.mxu0 }
 0x153   : > { %v650_v60 = vpack.c.bf16 %v641_v59, %v641_v59 }
 0x154   : > { %v1436_v61 = vpop.f32.mrf.mxu0 }
 0x155   : > { %1001 = vrot.lane.b32.xlu1 %v648_v24, %s1902_s13  ;;  %1003 = vrot.lane.b32.xlu0 %v649_v21, %s1902_s13  ;;  %v723_v62 = vsel %vm721_vm4, %v650_v60, 0 }
 0x156   : > { %1441 = vmatmul.mubr.msk.bf16.vlgmr.msra.gmra.mxu1 %vm659_vm2, %v648_v24  ;;  %v644_v63 = vpop.f32.mrf.mxu0  ;;  %1445 = vmatpush3.bf16.msra.mxu0 %v723_v62 }
 0x157   : > { %1452 = vmatprep.mubr.msk.bf16.mxu1 %vm1898_vm0, %v1897_v0  ;;  %1456 = vmatprep.subr.bf16.mxu0 %v1897_v0 }
 0x158   : > { %v1437_v1 = vpop.f32.mrf.mxu0 }
 0x159   : > { %655 = vperm.xlu0 %1614, %v651_v30  }
 0x1bf   : > { %v771_v39 = vpop.permute.xlu0 %770  ;;  %v888_v41 = vpop.permute.xlu1 %887 }
 0x1c0   : > { %v776_v40 = vsel %vm659_vm2, %v771_v39, 0  ;;  %v893_v43 = vsel %vm659_vm2, %v888_v41, 0 }
 0x1c1   : > { %1451 = vmatpush3.bf16.xpose.msra.mxu1 %v776_v40 }
 0x1c2   : > { %1462 = vmatprep.subr.bf16.mxu1 %v1897_v0 }
 0x1c3   : > { %v768_v42 = vpop.permute.xlu0 %767  ;;  %v886_v45 = vpop.permute.xlu1 %885 }
 0x1c7   : > { %v1004_v44 = vpop.permute.xlu0 %1003  ;;  %v1002_v47 = vpop.permute.xlu1 %1001 }
 0x1c8   : > { %1453 = vmatmul.mubr.msk.bf16.vlgmr.msra.gmra.mxu1 %vm659_vm2, %v768_v42  ;;  %v1009_v46 = vsel %vm659_vm2, %v1004_v44, 0 }
 0x1c9   : > { %1463 = vmatpush3.bf16.xpose.msra.mxu1 %v893_v43  ;;  %1464 = vmatprep.mubr.msk.bf16.mxu1 %vm1898_vm0, %v1897_v0 }
 0x1ca   : > { %1474 = vmatprep.subr.bf16.mxu1 %v1897_v0 }
 0x1d0   : > { %1465 = vmatmul.mubr.msk.bf16.vlgmr.msra.gmra.mxu1 %vm659_vm2, %v886_v45 }
 0x1d1   : > { %1475 = vmatpush3.bf16.xpose.msra.mxu1 %v1009_v46  ;;  %1476 = vmatprep.mubr.msk.bf16.mxu1 %vm1898_vm0, %v1897_v0 }
 0x1d2   : > { %1486 = vmatprep.subr.bf16.mxu1 %v1897_v0 }
 0x1d4   : > { %v656_v50 = vpop.permute.xlu0 %655 }
 0x1d5   : > { %vm657_vm3 = vcmp.lt.s32.totalorder %v653_v49, %v656_v50 }
 0x1d6   : > { %v658_v52 = vsel %vm657_vm3, 0.0, %v1903_v51 }
 0x1d8   : > { %1477 = vmatmul.mubr.msk.bf16.vlgmr.msra.gmra.mxu1 %vm659_vm2, %v1002_v47 }
 0x1d9   : > { %1490 = vmatprep.mubr.msk.bf16.mxu1 %vm1898_vm0, %v1897_v0 }
 0x216   : > { %v700_v53 = vpop.f32.mrf.mxu1 }
 0x217   : > { %v701_v54 = vadd.f32 %v700_v53, %v658_v52 }
 0x218   : > { %v1442_v55 = vpop.f32.mrf.mxu1 }
 0x219   : > { %v706_v56 = vsel %vm659_vm2, %v701_v54, -inf }
 0x21a   : > { %707 = vmax.xlane.f32.xlu1 %v706_v56  ;;  %v703_v57 = vpop.f32.mrf.mxu1 }
 0x21c   : > { %v1443_v58 = vpop.f32.mrf.mxu1 }
 0x288   : > { %v812_v2 = vpop.f32.mrf.mxu1 }
 0x289   : > { %v813_v3 = vadd.f32 %v812_v2, %v658_v52 }
 0x28a   : > { %v1454_v4 = vpop.f32.mrf.mxu1 }
 0x28b   : > { %v818_v5 = vsel %vm659_vm2, %v813_v3, -inf }
 0x28c   : > { %819 = vmax.xlane.f32.xlu0 %v818_v5  ;;  %v815_v6 = vpop.f32.mrf.mxu1 }
 0x28d   : > { %v513_v6 = vld [vmem:[#allocation12 + $0x10] sm:$0xff] }
 0x28e   : > { %v1455_v7 = vpop.f32.mrf.mxu1 }
 0x28f   : > { %v514_v7 = vld [vmem:[#allocation12 + $0x18] sm:$0xff] }
 0x290   : > { %v929_v8 = vpop.f32.mrf.mxu1 }
 0x291   : > { %v930_v9 = vadd.f32 %v929_v8, %v658_v52  ;;  %v511_v8 = vld [vmem:[#allocation12] sm:$0xff] }
 0x292   : > { %v1466_v10 = vpop.f32.mrf.mxu1 }
 0x293   : > { %v935_v11 = vsel %vm659_vm2, %v930_v9, -inf  ;;  %v512_v10 = vld [vmem:[#allocation12 + $0x8] sm:$0xff] }
 0x294   : > { %936 = vmax.xlane.f32.xlu1 %v935_v11  ;;  %v932_v12 = vpop.f32.mrf.mxu1 }
 0x295   : > { %v515_v12 = vpack.c.bf16 %v512_v10, %v511_v8 }
 0x296   : > { %v1467_v13 = vpop.f32.mrf.mxu1 }
 0x298   : > { %v1045_v14 = vpop.f32.mrf.mxu1 }
 0x299   : > { %v1046_v15 = vadd.f32 %v1045_v14, %v658_v52 }
 0x29a   : > { %v1478_v16 = vpop.f32.mrf.mxu1 }
 0x29b   : > { %v1051_v17 = vsel %vm659_vm2, %v1046_v15, -inf }
 0x29c   : > { %1052 = vmax.xlane.f32.xlu0 %v1051_v17  ;;  %v1048_v18 = vpop.f32.mrf.mxu1 }
 0x29e   : > { %v1479_v19 = vpop.f32.mrf.mxu1 }
 0x2a3   : > { %v708_v20 = vpop.xlane.xlu1 %707 }
 0x2a4   : > { %v709_v21 = vsub.f32 %v701_v54, %v708_v20 }
 0x2a6   : > { %v710_v22 = vmul.f32 1.442695, %v709_v21 }
 0x2a8   : > { %1615 = vpow2.f32 %v710_v22 }
 0x2b5   : > { %v1616_v23 = vpop.eup %1615 }
 0x2b6   : > { %v712_v24 = vsel %vm659_vm2, %v1616_v23, 0.0 }
 0x2b7   : > { %713 = vadd.xlane.f32.xlu1 %v712_v24 }
 0x2c8   : > { %831 = vrot.lane.b32.xlu1 %v650_v60, %s1901_s15  ;;  %s1797_s15 = scalar_lea.vmem %s1796_s25, 256 }
 0x315   : > { %v820_v25 = vpop.xlane.xlu0 %819 }
 0x316   : > { %v821_v26 = vsub.f32 %v813_v3, %v820_v25 }
 0x318   : > { %v822_v27 = vmul.f32 1.442695, %v821_v26 }
 0x31a   : > { %1617 = vpow2.f32 %v822_v27 }
 0x31d   : > { %v937_v28 = vpop.xlane.xlu1 %936 }
 0x31e   : > { %v938_v29 = vsub.f32 %v930_v9, %v937_v28  ;;  %v516_v9 = vpack.c.bf16 %v514_v7, %v513_v6 }
 0x320   : > { %v939_v30 = vmul.f32 1.442695, %v938_v29  ;;  %1487 = vmatpush3.bf16.msra.mxu1 %v516_v9 }
 0x321   : > { %1488 = vmatprep.subr.bf16.mxu1 %v1897_v0 }
 0x322   : > { %1619 = vpow2.f32 %v939_v30 }
 0x324   : > { %1489 = vmatpush3.bf16.msra.mxu1 %v515_v12 }
 0x325   : > { %v1053_v31 = vpop.xlane.xlu0 %1052 }
 0x326   : > { %v1054_v32 = vsub.f32 %v1046_v15, %v1053_v31 }
 0x327   : > { %v1618_v33 = vpop.eup %1617 }
 0x328   : > { %v1055_v34 = vmul.f32 1.442695, %v1054_v32  ;;  %v824_v35 = vsel %vm659_vm2, %v1618_v33, 0.0 }
 0x329   : > { %825 = vadd.xlane.f32.xlu0 %v824_v35 }
 0x32a   : > { %1621 = vpow2.f32 %v1055_v34 }
 0x32f   : > { %v1620_v36 = vpop.eup %1619 }
 0x330   : > { %v941_v37 = vsel %vm659_vm2, %v1620_v36, 0.0 }
 0x331   : > { %942 = vadd.xlane.f32.xlu1 %v941_v37 }
 0x337   : > { %v1622_v38 = vpop.eup %1621 }
 0x338   : > { %v1057_v39 = vsel %vm659_vm2, %v1622_v38, 0.0 }
 0x339   : > { %1058 = vadd.xlane.f32.xlu0 %v1057_v39 }
 0x340   : > { %v714_v40 = vpop.xlane.xlu1 %713 }
 0x341   : > { %1623 = vrcp.f32 %v714_v40 }
 0x342   : > { %1063 = vrot.lane.b32.xlu1 %v650_v60, %s1902_s13 }
 0x344   : > { %v832_v42 = vpop.permute.xlu1 %831 }
 0x345   : > { %v837_v45 = vsel %vm721_vm4, %v832_v42, 0 }
 0x34e   : > { %v1624_v41 = vpop.eup %1623 }
 0x34f   : > { %947 = vrot.lane.b32.xlu0 %v650_v60, %s1900_s20  ;;  %v716_v43 = vmul.f32 %v1624_v41, %v1616_v23  ;;  %s1791_s20 = scalar_lea.vmem %s2249_s22, 128 }
 0x350   : > { %p1792_p6 = scmp.ne.s32.totalorder %s2249_s22, %s1791_s20  ;;  %p1799_p4 = scmp.lt.s32.totalorder %s1797_s15, %s1791_s20 }
 0x351   : > { %v717_v44 = vpack.c.bf16 %v716_v43, %v716_v43 }
 0x352   : > { %p1793_p5 = pnand %p1792_p6, %p2071_p2  ;;  %p1800_p1 = por %p1799_p4, %p1798_p13 }
 0x353   : > { %1447 = vmatmul.mubr.msk.bf16.vlgmr.msra.gmra.mxu0 %vm659_vm2, %v717_v44 }
 0x354   : > { %1457 = vmatpush3.bf16.msra.mxu0 %v837_v45  ;;  %1458 = vmatprep.mubr.msk.bf16.mxu0 %vm1898_vm0, %v1897_v0  ;;  %p1794_p11 = pneg %p1793_p5 }
 0x355   : > { %1468 = vmatprep.subr.bf16.mxu0 %v1897_v0 }
 0x356   : > { %p1801_p3 = pnand %p1800_p1, %p1794_p11 }
 0x3b2   : > { %v826_v46 = vpop.xlane.xlu0 %825 }
 0x3b3   : > { %1625 = vrcp.f32 %v826_v46 }
 0x3ba   : > { %v943_v47 = vpop.xlane.xlu1 %942 }
 0x3bb   : > { %1627 = vrcp.f32 %v943_v47 }
 0x3be   : > { %v1064_v56 = vpop.permute.xlu1 %1063 }
 0x3bf   : > { %v1069_v58 = vsel %vm721_vm4, %v1064_v56, 0 }
 0x3c0   : > { %v1626_v48 = vpop.eup %1625 }
 0x3c1   : > { %v828_v49 = vmul.f32 %v1626_v48, %v1618_v33 }
 0x3c2   : > { %v1059_v50 = vpop.xlane.xlu0 %1058 }
 0x3c3   : > { %1629 = vrcp.f32 %v1059_v50  ;;  %v829_v51 = vpack.c.bf16 %v828_v49, %v828_v49 }
 0x3c5   : > { %1459 = vmatmul.mubr.msk.bf16.vlgmr.msra.gmra.mxu0 %vm659_vm2, %v829_v51 }
 0x3c6   : > { %v948_v52 = vpop.permute.xlu0 %947  ;;  %1470 = vmatprep.mubr.msk.bf16.mxu0 %vm1898_vm0, %v1897_v0 }
 0x3c7   : > { %v953_v53 = vsel %vm721_vm4, %v948_v52, 0 }
 0x3c8   : > { %v1628_v54 = vpop.eup %1627  ;;  %1469 = vmatpush3.bf16.msra.mxu0 %v953_v53 }
 0x3c9   : > { %1480 = vmatprep.subr.bf16.mxu0 %v1897_v0  ;;  %v945_v55 = vmul.f32 %v1628_v54, %v1620_v36 }
 0x3cb   : > { %v946_v57 = vpack.c.bf16 %v945_v55, %v945_v55 }
 0x3cd   : > { %1471 = vmatmul.mubr.msk.bf16.vlgmr.msra.gmra.mxu0 %vm659_vm2, %v946_v57 }
 0x3ce   : > { %1481 = vmatpush3.bf16.msra.mxu0 %v1069_v58  ;;  %1482 = vmatprep.mubr.msk.bf16.mxu0 %vm1898_vm0, %v1897_v0 }
 0x3d0   : > { %v1630_v59 = vpop.eup %1629 }
 0x3d1   : > { %v1061_v60 = vmul.f32 %v1630_v59, %v1622_v38 }
 0x3d3   : > { %v1062_v61 = vpack.c.bf16 %v1061_v60, %v1061_v60 }
 0x3d5   : > { %1483 = vmatmul.mubr.msk.bf16.vlgmr.msra.gmra.mxu0 %vm659_vm2, %v1062_v61 }
 0x413   : > { %v759_v62 = vpop.f32.mrf.mxu0 }
 0x414   : > { %765 = vst.msk [vmem:[#allocation2] sm:$0xff] %vm659_vm2, %v759_v62 }
 0x415   : > { %v1448_v63 = vpop.f32.mrf.mxu0 }
 0x417   : > { %v762_v1 = vpop.f32.mrf.mxu0 }
 0x419   : > { %v1449_v2 = vpop.f32.mrf.mxu0 }
 0x485   : > { %v873_v3 = vpop.f32.mrf.mxu0 }
 0x486   : > { %880 = vrot.lane.b32.xlu1 %v873_v3, %s1904_s1 }
 0x487   : > { %v1460_v4 = vpop.f32.mrf.mxu0 }
 0x489   : > { %v876_v5 = vpop.f32.mrf.mxu0 }
 0x48b   : > { %v1461_v11 = vpop.f32.mrf.mxu0 }
 0x48d   : > { %v989_v13 = vpop.f32.mrf.mxu0 }
 0x48e   : > { %996 = vrot.lane.b32.xlu0 %v989_v13, %s1905_s23 }
 0x48f   : > { %v1472_v14 = vpop.f32.mrf.mxu0 }
 0x491   : > { %v992_v15 = vpop.f32.mrf.mxu0 }
 0x493   : > { %v1473_v16 = vpop.f32.mrf.mxu0 }
 0x495   : > { %v1105_v17 = vpop.f32.mrf.mxu0 }
 0x496   : > { %1112 = vrot.lane.b32.xlu1 %v1105_v17, %s1906_s6 }
 0x497   : > { %v1484_v18 = vpop.f32.mrf.mxu0 }
 0x499   : > { %v1108_v19 = vpop.f32.mrf.mxu0 }
 0x49b   : > { %v1485_v20 = vpop.f32.mrf.mxu0 }
 0x4f8   : > { %v881_v21 = vpop.permute.xlu1 %880 }
 0x4f9   : > { %884 = vst.msk [vmem:[#allocation2] sm:$0xff] %vm883_vm5, %v881_v21 }
 0x500   : > { %v997_v22 = vpop.permute.xlu0 %996 }
 0x501   : > { %1000 = vst.msk [vmem:[#allocation2] sm:$0xff] %vm999_vm6, %v997_v22 }
 0x508   : > { %v1113_v0 = vpop.permute.xlu1 %1112 }
 0x509   : > { %1116 = vst.msk [vmem:[#allocation2] sm:$0xff] %vm1115_vm7, %v1113_v0 }
 0x510   : > { %v1117_v23 = vld [vmem:[#allocation2] sm:$0xff] }
 0x511   : > { %v1118_v24 = vpack.c.bf16 %v1117_v23, %v1117_v23 }
 0x513   : > { %1491 = vmatmul.mubr.msk.bf16.vlgmr.msra.gmra.mxu1 %vm517_vm1, %v1118_v24 }
 0x5d3   : > { %v1156_v25 = vpop.f32.mrf.mxu1 }
 0x5d4   : > { %1162 = vst.msk [vmem:[%s471_s12] sm:$0xff] %vm517_vm1, %v1156_v25 }
 0x5d5   : > { %v1492_v26 = vpop.f32.mrf.mxu1 }
 0x5d6   : > { %1804 = shalt.err (!%p1801_p3)
}
 0x5d7   : > { %s1805_s26 = scalar_lea.hbm %s2247_s24, 128  ;;  %s1809_s4 = scalar_lea.hbm %s2304_s8, 256 }
 0x5d8   : > { %p1806_p9 = scmp.ne.s32.totalorder %s2247_s24, %s1805_s26  ;;  %p1810_p12 = scmp.lt.s32.totalorder %s2247_s24, %s2304_s8 }
 0x5d9   : > { %p1811_p0 = scmp.lt.s32.totalorder %s1809_s4, %s1805_s26 }
 0x5da   : > { %p1807_p10 = pnand %p1806_p9, %p2071_p2 }
 0x5db   : > { %p1812_p6 = por %p1811_p0, %p1810_p12 }
 0x5dc   : > { %p1808_p7 = pneg %p1807_p10 }
 0x5de   : > { %p1813_p5 = pnand %p1812_p6, %p1808_p7 }
 0x5e0   : > { %1816 = shalt.err (!%p1813_p5)
}
 0x5e1   : > { %1514 = dma.vmem_to_hbm [thread:$0]  (%p2071_p2), %s2249_s22, 128, %s2247_s24, %s1164_s17   ;;  %v1159_v27 = vpop.f32.mrf.mxu1 }
 0x5e3   : > { %v1493_v28 = vpop.f32.mrf.mxu1 }
 0x5e4 PF: > { %s1190_s23 = sand.u32 1, %s1867_s27   ;;  %p2331_p11 = scmp.ge.s32.totalorder %s1887_s10, 2 }
 0x5e5   : > { %s1191_s6 = scalar_lea.sflag [#allocation5], %s1190_s23 }
 0x5e6   : > { %p1537_p13 = pnand %p2331_p11, %p2078_p8 }
 0x5e8   : > { %p1538_p4 = pneg %p1537_p13 }
 0x5ea   : > { %1862 = dma.done.wait (%p1538_p4), %s1191_s6, 128  }
 0x5eb   : > { %1864 = vsyncadd (%p1538_p4), %s1191_s6, 4294967168  ;;  %s29_s10 = sadd.s32 1, %s1887_s10   ;;  %s2332_s14 = sld [smem:[#allocation21_spill]] }
 0x5ec   : > { %p26_p1 = scmp.ge.s32.totalorder %s29_s10, 4   ;;  %s2333_s27 = smov %s1871_s28 }
 0x5ed   : > { %s2334_s28 = smov %s1875_s29  ;;  %s2335_s29 = smov %s2076_s16 }
 0x5ee   : > { %s2336_s30 = smov %s1883_s9  ;;  %28 = sbr.rel (!%p26_p1) target bundleno = 16 (0x10), region = 132 }
 0x5f1   : > { %s2337_s9 = smov %s2332_s14 }
 0x5f3   :  { %1196 = vsyncpa [#allocation4], 1 }
 0x5f4   :  { %1198 = vsyncpa [#allocation4 + $0x1], 1 }
 0x5f5   :  { %1199 = vsyncpa [#allocation7], 1 }
 0x5f6   :  { %1201 = vsyncpa [#allocation7 + $0x1], 1 }
 0x5f7   :  { %1202 = vsyncpa [#allocation10], 1 }
 0x5f8   :  { %1203 = vsyncpa [#allocation13], 1 }
 0x5f9   :  { %1204 = vsyncpa [#allocation5], 1 }
 0x5fa   :  { %1206 = vsyncpa [#allocation5 + $0x1], 1 }

</bundles_post_ra>
